<compile_context>
chip_gen: v7x
topology: tpu7x:2x2x1
jax: 0.10.0
libtpu: 0.0.40
codegen_flags: <defaults>
</compile_context>

<pallas_src>
import functools

import jax
import jax.numpy as jnp
import numpy as np
from jax.experimental import pallas as pl
from jax.experimental.pallas import tpu as pltpu

_LANE = 128
_SUB = 8


def _rup(x, m):
    return (x + m - 1) // m * m


# ----------------------------------------------------------------------------
# Fused whole-sequence kernel (hot path)
# ----------------------------------------------------------------------------
def _gru_seq_kernel(h0_ref, gi_ref, wc_ref, bc_ref, out_ref, h_scr):
    """One recurrent step t = program_id(0) + 1 of the fused sequence.

    h0_ref : (Np, Cp)        initial hidden state (= lv[0]), VMEM-resident
    gi_ref : (1, Np, 3*Cp)   hoisted lv[t] @ W_ih + b_ih for this step
    wc_ref : (Cp, 4*Cp)      [W_hl | W_hl @ W_hh]   (VMEM-resident)
    bc_ref : (1, 4*Cp)       [b_hl | b_hl @ W_hh + b_hh]
    out_ref: (1, Np, Cp)     new_lv[t]
    h_scr  : (Np, Cp)        carried hidden state (VMEM scratch)
    """
    Cp = h0_ref.shape[1]

    @pl.when(pl.program_id(0) == 0)
    def _():
        h_scr[...] = h0_ref[...]

    # Single recurrent MXU op: hidden_linear and the hh gate matmul fused.
    comb = jnp.dot(h_scr[...], wc_ref[...],
                   preferred_element_type=jnp.float32) + bc_ref[...]
    h = comb[:, :Cp]            # hidden_linear(h_prev)
    gh = comb[:, Cp:]           # h @ W_hh + b_hh
    gi = gi_ref[0]              # precomputed lv[t] @ W_ih + b_ih

    r = jax.nn.sigmoid(gi[:, :Cp] + gh[:, :Cp])
    z = jax.nn.sigmoid(gi[:, Cp:2 * Cp] + gh[:, Cp:2 * Cp])
    n = jnp.tanh(gi[:, 2 * Cp:] + r * gh[:, 2 * Cp:])
    new_h = (1.0 - z) * n + z * h

    h_scr[...] = new_h
    out_ref[0] = new_h


@jax.jit
def gru_module_sequence(lvs, params):
    """Run the whole GRUModule recurrence over a (T, N, C) sequence in one
    pallas_call.  Returns (T, N, C) of new_lv (out[0] == lvs[0])."""
    T, N, C = lvs.shape
    if T == 1:
        return lvs
    Np, Cp = _rup(N, _SUB), _rup(C, _LANE)

    lv_p = jnp.zeros((T, Np, Cp), jnp.float32).at[:, :N, :C].set(lvs)

    # Hoisted (non-recurrent) input-gate matmul for all timesteps at once.
    gi_all = jnp.einsum("tnc,cg->tng", lv_p[1:], params["w_ih_p"]) + params["b_ih_p"]

    out = pl.pallas_call(
        _gru_seq_kernel,
        out_shape=jax.ShapeDtypeStruct((T - 1, Np, Cp), jnp.float32),
        grid_spec=pltpu.PrefetchScalarGridSpec(
            num_scalar_prefetch=0,
            grid=(T - 1,),
            in_specs=[
                pl.BlockSpec((Np, Cp), lambda s: (0, 0)),            # h0 (resident)
                pl.BlockSpec((1, Np, 3 * Cp), lambda s: (s, 0, 0)),  # gi[t]
                pl.BlockSpec((Cp, 4 * Cp), lambda s: (0, 0)),        # W_comb (resident)
                pl.BlockSpec((1, 4 * Cp), lambda s: (0, 0)),         # b_comb (resident)
            ],
            out_specs=pl.BlockSpec((1, Np, Cp), lambda s: (s, 0, 0)),
            scratch_shapes=[pltpu.VMEM((Np, Cp), jnp.float32)],       # carried hidden
        ),
        compiler_params=pltpu.CompilerParams(
            dimension_semantics=("arbitrary",)),                      # time = recurrence
    )(lv_p[0], gi_all, params["w_comb_p"], params["b_comb_p"])

    return jnp.concatenate([lvs[:1], out[:, :N, :C]], axis=0)


# ----------------------------------------------------------------------------
# Per-step kernel (stateful API parity; handles h_lv with fewer rows than lv)
# ----------------------------------------------------------------------------
def _gru_step_kernel(lv_ref, h_ref, m_ref, w_hl_ref, b_hl_ref,
                     w_ih_ref, b_ih_ref, w_hh_ref, b_hh_ref, out_ref):
    Cp = lv_ref.shape[1]
    # hidden_linear, then zero rows beyond h_prev's length.  The mask is applied
    # AFTER the linear (torch pads AFTER hidden_linear), so padded rows get
    # h == 0 and gh == b_hh.
    h = (jnp.dot(h_ref[...], w_hl_ref[...],
                 preferred_element_type=jnp.float32) + b_hl_ref[...]) * m_ref[...]
    gi = jnp.dot(lv_ref[...], w_ih_ref[...],
                 preferred_element_type=jnp.float32) + b_ih_ref[...]
    gh = jnp.dot(h, w_hh_ref[...],
                 preferred_element_type=jnp.float32) + b_hh_ref[...]
    r = jax.nn.sigmoid(gi[:, :Cp] + gh[:, :Cp])
    z = jax.nn.sigmoid(gi[:, Cp:2 * Cp] + gh[:, Cp:2 * Cp])
    n = jnp.tanh(gi[:, 2 * Cp:] + r * gh[:, 2 * Cp:])
    out_ref[...] = (1.0 - z) * n + z * h


@jax.jit
def gru_module_step(lv, h_prev, params):
    """One GRUModule update (the `h_lv is not None` branch), Pallas-backed."""
    N, C = lv.shape
    n_prev = h_prev.shape[0]
    Np, Cp = _rup(N, _SUB), _rup(C, _LANE)

    lv_p = jnp.zeros((Np, Cp), jnp.float32).at[:N, :C].set(lv)
    h_p = jnp.zeros((Np, Cp), jnp.float32).at[:n_prev, :C].set(h_prev)
    row_mask = (jnp.arange(Np, dtype=jnp.int32) < n_prev
                ).astype(jnp.float32).reshape(Np, 1)

    full = lambda shape: pl.BlockSpec(shape, lambda: tuple(0 for _ in shape))
    out = pl.pallas_call(
        _gru_step_kernel,
        out_shape=jax.ShapeDtypeStruct((Np, Cp), jnp.float32),
        in_specs=[
            full((Np, Cp)),        # lv
            full((Np, Cp)),        # h_prev (zero-row padded)
            full((Np, 1)),         # row mask (1 for rows < n_prev)
            full((Cp, Cp)),        # W_hl^T (lane padded)
            full((1, Cp)),         # b_hl
            full((Cp, 3 * Cp)),    # W_ih^T
            full((1, 3 * Cp)),     # b_ih
            full((Cp, 3 * Cp)),    # W_hh^T
            full((1, 3 * Cp)),     # b_hh
        ],
        out_specs=full((Np, Cp)),
        input_output_aliases={1: 0},   # donate the padded h_prev buffer
    )(lv_p, h_p, row_mask,
      params["w_hl_p"], params["b_hl_p"],
      params["w_ih_p"], params["b_ih_p"],
      params["w_hh_p"], params["b_hh_p"])
    return out[:N, :C]


# ----------------------------------------------------------------------------
# Parameters
# ----------------------------------------------------------------------------
def init_params(key, C):
    """Raw params in PyTorch layout: Linear (out,in), GRUCell (3C,C), gates [r|z|n]."""
    k = 1.0 / np.sqrt(C)
    ks = jax.random.split(key, 6)
    u = lambda kk, shape: jax.random.uniform(kk, shape, jnp.float32, -k, k)
    return {
        "w_hl": u(ks[0], (C, C)), "b_hl": u(ks[1], (C,)),
        "w_ih": u(ks[2], (3 * C, C)), "b_ih": u(ks[3], (3 * C,)),
        "w_hh": u(ks[4], (3 * C, C)), "b_hh": u(ks[5], (3 * C,)),
    }


def pad_params(raw):
    """Transpose to (in, out), zero-pad channels to a 128-lane multiple with each
    gate in its own lane-aligned block, and precompute the folded recurrent
    weight W_comb = [W_hl | W_hl @ W_hh] (plus bias)."""
    C = raw["w_hl"].shape[0]
    Cp = _rup(C, _LANE)

    def pad_linear(w, b):
        wp = jnp.zeros((Cp, Cp), jnp.float32).at[:C, :C].set(w.T)
        bp = jnp.zeros((1, Cp), jnp.float32).at[0, :C].set(b)
        return wp, bp

    def pad_gates(w, b):
        wt = w.T                                  # (C, 3C)
        wp = jnp.zeros((Cp, 3 * Cp), jnp.float32)
        bp = jnp.zeros((1, 3 * Cp), jnp.float32)
        for g in range(3):                        # keep each gate lane-aligned
            wp = wp.at[:C, g * Cp:g * Cp + C].set(wt[:, g * C:(g + 1) * C])
            bp = bp.at[0, g * Cp:g * Cp + C].set(b[g * C:(g + 1) * C])
        return wp, bp

    w_hl_p, b_hl_p = pad_linear(raw["w_hl"], raw["b_hl"])
    w_ih_p, b_ih_p = pad_gates(raw["w_ih"], raw["b_ih"])
    w_hh_p, b_hh_p = pad_gates(raw["w_hh"], raw["b_hh"])

    # Fold hidden_linear into the recurrent gate matmul (one MXU op per step).
    w_comb_p = jnp.concatenate([w_hl_p, w_hl_p @ w_hh_p], axis=1)            # (Cp, 4Cp)
    b_comb_p = jnp.concatenate([b_hl_p, b_hl_p @ w_hh_p + b_hh_p], axis=1)   # (1, 4Cp)

    return {
        "w_hl_p": w_hl_p, "b_hl_p": b_hl_p,
        "w_ih_p": w_ih_p, "b_ih_p": b_ih_p,
        "w_hh_p": w_hh_p, "b_hh_p": b_hh_p,
        "w_comb_p": w_comb_p, "b_comb_p": b_comb_p,
    }


# ----------------------------------------------------------------------------
# Stateful wrapper + pure-JAX reference
# ----------------------------------------------------------------------------
class GRUModuleJax:
    """Stateful wrapper reproducing GRUModule.forward semantics."""

    def __init__(self, params):
        self.params = params
        self.h_lv = None

    def reset_sequence(self):
        self.h_lv = None

    def forward(self, lv, ls_values):
        if self.h_lv is None:
            new_lv = lv                                  # lv.clone()
            self.h_lv = lv
        else:
            new_lv = gru_module_step(lv, self.h_lv, self.params)
            self.h_lv = new_lv
            # TODO(synk): `ls.set_values(new_lv)` mutates an external lattice structure;
            # no Pallas equivalent — we return new_lv as the updated lattice values.
            ls_values = new_lv
        return new_lv, ls_values

    def run_sequence(self, lvs):
        """Hot path: all T steps fused into one pallas_call (uniform row count)."""
        outs = gru_module_sequence(lvs, self.params)
        self.h_lv = outs[-1]
        return outs


def _reference_step(lv, h_prev, raw):
    """Pure-JAX reference of hidden_linear + pad_sequence + GRUCell."""
    C = lv.shape[1]
    h = h_prev @ raw["w_hl"].T + raw["b_hl"]
    if h.shape[0] < lv.shape[0]:                 # pad AFTER the linear, like torch
        h = jnp.pad(h, ((0, lv.shape[0] - h.shape[0]), (0, 0)))
    gi = lv @ raw["w_ih"].T + raw["b_ih"]
    gh = h @ raw["w_hh"].T + raw["b_hh"]
    r = jax.nn.sigmoid(gi[:, :C] + gh[:, :C])
    z = jax.nn.sigmoid(gi[:, C:2 * C] + gh[:, C:2 * C])
    n = jnp.tanh(gi[:, 2 * C:] + r * gh[:, 2 * C:])
    return (1.0 - z) * n + z * h


if __name__ == "__main__":
    key = jax.random.PRNGKey(0)
    C = 32      # nr_output_channels
    N = 8       # lattice points per step
    T = 6       # sequence length

    pkey, xkey = jax.random.split(key)
    raw = init_params(pkey, C)
    params = pad_params(raw)

    # ---- fused-sequence hot path: one pallas_call for the whole recurrence ----
    lvs = jax.random.normal(xkey, (T, N, C), jnp.float32)
    module = GRUModuleJax(params)
    outs = jax.block_until_ready(module.run_sequence(lvs))

    ref_h = lvs[0]
    ref_outs = [lvs[0]]
    for t in range(1, T):
        ref_h = _reference_step(lvs[t], ref_h, raw)
        ref_outs.append(ref_h)
    ref_outs = jnp.stack(ref_outs)
    np.testing.assert_allclose(np.asarray(outs), np.asarray(ref_outs),
                               rtol=1e-4, atol=1e-4)

    # ---- stateful per-step path, including a growing lattice (h_lv shorter than
    #      lv) to exercise the pad-AFTER-hidden_linear semantics ----
    module.reset_sequence()
    sizes = [6, 8, 8]
    skeys = jax.random.split(jax.random.fold_in(key, 1), len(sizes))
    ref_h = None
    for n_t, sk in zip(sizes, skeys):
        lv = jax.random.normal(sk, (n_t, C), jnp.float32)
        out, _ = module.forward(lv, ls_values=lv)
        out = jax.block_until_ready(out)
        if ref_h is None:
            ref_out = lv
            ref_h = lv
        else:
            ref_out = _reference_step(lv, ref_h, raw)
            ref_h = ref_out
        np.testing.assert_allclose(np.asarray(out), np.asarray(ref_out),
                                   rtol=1e-4, atol=1e-4)

    print("KERNEL_OK")
</pallas_src>

<mosaic_0001>
module attributes {stable_mosaic.version = 11 : i64} {
  func.func @_gru_seq_kernel(%arg0: i32, %arg1: memref<8x128xf32, #tpu.memory_space<vmem>>, %arg2: memref<1x8x384xf32, #tpu.memory_space<vmem>>, %arg3: memref<128x512xf32, #tpu.memory_space<vmem>>, %arg4: memref<1x512xf32, #tpu.memory_space<vmem>>, %arg5: memref<1x8x128xf32, #tpu.memory_space<vmem>>, %arg6: memref<8x128xf32, #tpu.memory_space<vmem>>) attributes {dimension_semantics = [#tpu.dimension_semantics<arbitrary>], iteration_bounds = array<i64: 5>, scalar_prefetch = 0 : i64, scratch_operands = 1 : i64, tpu.core_type = #tpu.core_type<tc>, window_params = [{pipeline_mode = #tpu.pipeline_mode<synchronous>, transform_indices = @transform_0, window_bounds = array<i64: 8, 128>}, {transform_indices = @transform_1, window_bounds = array<i64: 1, 8, 384>}, {pipeline_mode = #tpu.pipeline_mode<synchronous>, transform_indices = @transform_2, window_bounds = array<i64: 128, 512>}, {pipeline_mode = #tpu.pipeline_mode<synchronous>, transform_indices = @transform_3, window_bounds = array<i64: 1, 512>}, {transform_indices = @transform_4, window_bounds = array<i64: 1, 8, 128>}]} {
    %c0_i32 = arith.constant 0 : i32
    %0 = arith.cmpi eq, %arg0, %c0_i32 : i32
    %1 = arith.extui %0 : i1 to i32
    %c0_i32_0 = arith.constant 0 : i32
    %2 = arith.cmpi ne, %1, %c0_i32_0 : i32
    scf.if %2 {
      %c0_17 = arith.constant 0 : index
      %c0_18 = arith.constant 0 : index
      %43 = vector.load %arg1[%c0_17, %c0_18] : memref<8x128xf32, #tpu.memory_space<vmem>>, vector<8x128xf32>
      %c0_19 = arith.constant 0 : index
      %c0_20 = arith.constant 0 : index
      %44 = vector.load %arg6[%c0_19, %c0_20] : memref<8x128xf32, #tpu.memory_space<vmem>>, vector<8x128xf32>
      tpu.vector_store %arg6[%c0_19, %c0_20], %43 {strides = array<i32>} : memref<8x128xf32, #tpu.memory_space<vmem>>, vector<8x128xf32>,
    } else {
    }
    %c0 = arith.constant 0 : index
    %c0_1 = arith.constant 0 : index
    %3 = vector.load %arg6[%c0, %c0_1] : memref<8x128xf32, #tpu.memory_space<vmem>>, vector<8x128xf32>
    %c0_2 = arith.constant 0 : index
    %c0_3 = arith.constant 0 : index
    %4 = vector.load %arg3[%c0_2, %c0_3] : memref<128x512xf32, #tpu.memory_space<vmem>>, vector<128x512xf32>
    %cst = arith.constant dense<0.000000e+00> : vector<8x512xf32>
    %5 = tpu.matmul %3, %4, %cst {dimension_numbers = #tpu.dot_dimension_numbers<[1], [0], [0], [1], [0, 0, 1, 1], [], []>} : vector<8x128xf32>, vector<128x512xf32>, vector<8x512xf32> -> vector<8x512xf32>
    %c0_4 = arith.constant 0 : index
    %c0_5 = arith.constant 0 : index
    %6 = vector.load %arg4[%c0_4, %c0_5] : memref<1x512xf32, #tpu.memory_space<vmem>>, vector<1x512xf32>
    %7 = vector.broadcast %6 : vector<1x512xf32> to vector<8x512xf32>
    %8 = arith.addf %5, %7 : vector<8x512xf32>
    %9 = vector.extract_strided_slice %8 {offsets = [0, 0], sizes = [8, 128], strides = [1, 1]} : vector<8x512xf32> to vector<8x128xf32>
    %10 = vector.extract_strided_slice %8 {offsets = [0, 128], sizes = [8, 384], strides = [1, 1]} : vector<8x512xf32> to vector<8x384xf32>
    %c0_6 = arith.constant 0 : index
    %c0_7 = arith.constant 0 : index
    %c0_8 = arith.constant 0 : index
    %11 = vector.load %arg2[%c0_6, %c0_7, %c0_8] : memref<1x8x384xf32, #tpu.memory_space<vmem>>, vector<1x8x384xf32>
    %12 = vector.shape_cast %11 : vector<1x8x384xf32> to vector<8x384xf32>
    %13 = vector.extract_strided_slice %12 {offsets = [0, 0], sizes = [8, 128], strides = [1, 1]} : vector<8x384xf32> to vector<8x128xf32>
    %14 = vector.extract_strided_slice %10 {offsets = [0, 0], sizes = [8, 128], strides = [1, 1]} : vector<8x384xf32> to vector<8x128xf32>
    %15 = arith.addf %13, %14 : vector<8x128xf32>
    %16 = arith.negf %15 : vector<8x128xf32>
    %17 = math.exp %16 : vector<8x128xf32>
    %cst_9 = arith.constant 1.000000e+00 : f32
    %18 = vector.broadcast %cst_9 : f32 to vector<8x128xf32>
    %19 = arith.addf %18, %17 : vector<8x128xf32>
    %20 = arith.divf %18, %19 : vector<8x128xf32>
    %21 = vector.extract_strided_slice %12 {offsets = [0, 128], sizes = [8, 128], strides = [1, 1]} : vector<8x384xf32> to vector<8x128xf32>
    %22 = vector.extract_strided_slice %10 {offsets = [0, 128], sizes = [8, 128], strides = [1, 1]} : vector<8x384xf32> to vector<8x128xf32>
    %23 = arith.addf %21, %22 : vector<8x128xf32>
    %24 = arith.negf %23 : vector<8x128xf32>
    %25 = math.exp %24 : vector<8x128xf32>
    %cst_10 = arith.constant 1.000000e+00 : f32
    %26 = vector.broadcast %cst_10 : f32 to vector<8x128xf32>
    %27 = arith.addf %26, %25 : vector<8x128xf32>
    %28 = arith.divf %26, %27 : vector<8x128xf32>
    %29 = vector.extract_strided_slice %12 {offsets = [0, 256], sizes = [8, 128], strides = [1, 1]} : vector<8x384xf32> to vector<8x128xf32>
    %30 = vector.extract_strided_slice %10 {offsets = [0, 256], sizes = [8, 128], strides = [1, 1]} : vector<8x384xf32> to vector<8x128xf32>
    %31 = arith.mulf %20, %30 : vector<8x128xf32>
    %32 = arith.addf %29, %31 : vector<8x128xf32>
    %33 = math.tanh %32 : vector<8x128xf32>
    %cst_11 = arith.constant 1.000000e+00 : f32
    %34 = vector.broadcast %cst_11 : f32 to vector<8x128xf32>
    %35 = arith.subf %34, %28 : vector<8x128xf32>
    %36 = arith.mulf %35, %33 : vector<8x128xf32>
    %37 = arith.mulf %28, %9 : vector<8x128xf32>
    %38 = arith.addf %36, %37 : vector<8x128xf32>
    %c0_12 = arith.constant 0 : index
    %c0_13 = arith.constant 0 : index
    %39 = vector.load %arg6[%c0_12, %c0_13] : memref<8x128xf32, #tpu.memory_space<vmem>>, vector<8x128xf32>
    tpu.vector_store %arg6[%c0_12, %c0_13], %38 {strides = array<i32>} : memref<8x128xf32, #tpu.memory_space<vmem>>, vector<8x128xf32>,
    %c0_14 = arith.constant 0 : index
    %c0_15 = arith.constant 0 : index
    %c0_16 = arith.constant 0 : index
    %40 = vector.load %arg5[%c0_14, %c0_15, %c0_16] : memref<1x8x128xf32, #tpu.memory_space<vmem>>, vector<1x8x128xf32>
    %41 = vector.shape_cast %40 : vector<1x8x128xf32> to vector<8x128xf32>
    %42 = vector.shape_cast %38 : vector<8x128xf32> to vector<1x8x128xf32>
    tpu.vector_store %arg5[%c0_14, %c0_15, %c0_16], %42 {strides = array<i32>} : memref<1x8x128xf32, #tpu.memory_space<vmem>>, vector<1x8x128xf32>,
    return
  }
  func.func @transform_0(%arg0: i32) -> (i32, i32) {
    %c0_i32 = arith.constant 0 : i32
    %c0_i32_0 = arith.constant 0 : i32
    %c0_i32_1 = arith.constant 0 : i32
    return %c0_i32, %c0_i32_0 : i32, i32
  }
  func.func @transform_1(%arg0: i32) -> (i32, i32, i32) {
    %c0_i32 = arith.constant 0 : i32
    %c0_i32_0 = arith.constant 0 : i32
    %c0_i32_1 = arith.constant 0 : i32
    return %arg0, %c0_i32, %c0_i32_0 : i32, i32, i32
  }
  func.func @transform_2(%arg0: i32) -> (i32, i32) {
    %c0_i32 = arith.constant 0 : i32
    %c0_i32_0 = arith.constant 0 : i32
    %c0_i32_1 = arith.constant 0 : i32
    return %c0_i32, %c0_i32_0 : i32, i32
  }
  func.func @transform_3(%arg0: i32) -> (i32, i32) {
    %c0_i32 = arith.constant 0 : i32
    %c0_i32_0 = arith.constant 0 : i32
    %c0_i32_1 = arith.constant 0 : i32
    return %c0_i32, %c0_i32_0 : i32, i32
  }
  func.func @transform_4(%arg0: i32) -> (i32, i32, i32) {
    %c0_i32 = arith.constant 0 : i32
    %c0_i32_0 = arith.constant 0 : i32
    %c0_i32_1 = arith.constant 0 : i32
    return %arg0, %c0_i32, %c0_i32_0 : i32, i32, i32
  }
}

</mosaic_0001>

<bundles_post_ra>
// kernel: gru_module_sequence.1
= control target key start
LH: loop header
LB: loop body
LE: loop exit
PB: predicated region body
PF: predicated region fallthrough
CT: control target
= control target key end

     0   :  { %s640_s15 = smov 0   ;;  %s863_s0 = inlined_call_operand.vmem [shape: f32[8,128], index: 0, kind: input, shape index: {}]   ;;  %s864_s1 = inlined_call_operand.vmem [shape: f32[5,8,384], index: 1, kind: input, shape index: {}]   ;;  %s865_s2 = inlined_call_operand.vmem [shape: f32[128,512], index: 2, kind: input, shape index: {}]   ;;  %s866_s3 = inlined_call_operand.vmem [shape: f32[1,512], index: 3, kind: input, shape index: {}]   ;;  %s867_s4 = inlined_call_operand.vmem [shape: f32[5,8,128], index: 4, kind: output, shape index: {}]  }
   0x1 LB: > { %s510_s16 = sadd.s32 4294967295, %s612_s15   ;;  %p514_p0 = scmp.ge.s32.totalorder %s612_s15, 1  ;;  %s612_s15 = sphi %s640_s15, %s14_s15  }
   0x2   : > { %p162_p1 = scmp.lt.s32.totalorder %s612_s15, 6 }
   0x4   : > { %p163_p2 = pnand %p514_p0, %p162_p1 }
   0x5   : > { %p187_p3 = scmp.lt.s32.totalorder (!%p163_p2), %s510_s16, 4  ;;  %p517_p4 = scmp.ne.s32.totalorder (!%p163_p2), %s510_s16, 0 }
   0x6   : > { %166 = sbr.rel (%p163_p2) target bundleno = 321 (0x141), region = 36 }
   0xd   : > { %s188_s17 = scalar_select %p187_p3, %s510_s16, 4 }
   0xe   : > { %199 = sbr.rel (%p517_p4) target bundleno = 21 (0x15), region = 40  ;;  %v200_v0 = vld [vmem:[%s863_s0] sm:$0xff] (!%p517_p4) }
   0xf   : > { %s586_s18 = smul.u32 24, %s188_s17  ;;  %s516_s19 = sshll.u32 %s188_s17, 3  ;;  %201 = vst [vmem:[#allocation2] sm:$0xff] (!%p517_p4), %v200_v0 }
  0x10   : > { %s651_s22 = scalar_lea.vmem %s867_s4, %s516_s19 }
  0x11   : > { %s656_s25 = scalar_lea.vmem %s864_s1, %s586_s18 }
  0x15 PF: > { %v204_v1 = vld [vmem:[%s865_s2 + $0x8] sm:$0xff]  ;;  %v206_v3 = vld [vmem:[%s865_s2 + $0x18] sm:$0xff]  ;;  %v203_v6 = vld [vmem:[%s865_s2] sm:$0xff]  ;;  %v614_v8 = vmov 0.0  }
  0x16   : > { %v208_v2 = vld [vmem:[%s865_s2 + $0x28] sm:$0xff]  ;;  %v210_v5 = vld [vmem:[%s865_s2 + $0x38] sm:$0xff]  ;;  %v207_v7 = vld [vmem:[%s865_s2 + $0x20] sm:$0xff]  ;;  %353 = vmatprep.mubr.f32.mxu0 %v614_v8  ;;  %424 = vmatprep.mubr.f32.mxu1 %v614_v8 }
  0x17   : > { %v522_v4 = vpack.c.bf16 %v208_v2, %v204_v1  ;;  %v554_v9 = vpack.c.bf16 %v210_v5, %v206_v3  ;;  %v524_v10 = vpack.c.bf16 %v207_v7, %v203_v6  ;;  %v205_v11 = vld [vmem:[%s865_s2 + $0x10] sm:$0xff]  ;;  %v212_v13 = vld [vmem:[%s865_s2 + $0x48] sm:$0xff]  ;;  %v214_v16 = vld [vmem:[%s865_s2 + $0x58] sm:$0xff] }
  0x18   : > { %v209_v12 = vld [vmem:[%s865_s2 + $0x30] sm:$0xff]  ;;  %v216_v15 = vld [vmem:[%s865_s2 + $0x68] sm:$0xff]  ;;  %v218_v17 = vld [vmem:[%s865_s2 + $0x78] sm:$0xff] }
  0x19   : > { %523 = vmatprep.subr.bf16.mxu0 %v522_v4  ;;  %v556_v14 = vpack.c.bf16 %v209_v12, %v205_v11  ;;  %555 = vmatprep.subr.bf16.mxu1 %v554_v9  ;;  %v526_v18 = vpack.c.bf16 %v216_v15, %v212_v13  ;;  %v558_v19 = vpack.c.bf16 %v218_v17, %v214_v16  ;;  %v211_v20 = vld [vmem:[%s865_s2 + $0x40] sm:$0xff]  ;;  %v213_v22 = vld [vmem:[%s865_s2 + $0x50] sm:$0xff]  ;;  %v220_v25 = vld [vmem:[%s865_s2 + $0x88] sm:$0xff] }
  0x1a   : > { %525 = vmatpush1.bf16.msra.mxu0 %v524_v10  ;;  %v215_v21 = vld [vmem:[%s865_s2 + $0x60] sm:$0xff]  ;;  %v217_v24 = vld [vmem:[%s865_s2 + $0x70] sm:$0xff]  ;;  %v224_v26 = vld [vmem:[%s865_s2 + $0xa8] sm:$0xff] }
  0x1b   : > { %557 = vmatpush1.bf16.msra.mxu1 %v556_v14  ;;  %v528_v23 = vpack.c.bf16 %v215_v21, %v211_v20  ;;  %527 = vmatprep.subr.bf16.mxu0 %v526_v18  ;;  %v560_v27 = vpack.c.bf16 %v217_v24, %v213_v22  ;;  %v530_v28 = vpack.c.bf16 %v224_v26, %v220_v25  ;;  %v222_v29 = vld [vmem:[%s865_s2 + $0x98] sm:$0xff]  ;;  %v219_v31 = vld [vmem:[%s865_s2 + $0x80] sm:$0xff]  ;;  %v221_v34 = vld [vmem:[%s865_s2 + $0x90] sm:$0xff] }
  0x1c   : > { %559 = vmatprep.subr.bf16.mxu1 %v558_v19  ;;  %v226_v30 = vld [vmem:[%s865_s2 + $0xb8] sm:$0xff]  ;;  %v223_v33 = vld [vmem:[%s865_s2 + $0xa0] sm:$0xff]  ;;  %v225_v35 = vld [vmem:[%s865_s2 + $0xb0] sm:$0xff] }
  0x1d   : > { %v562_v32 = vpack.c.bf16 %v226_v30, %v222_v29  ;;  %v532_v36 = vpack.c.bf16 %v223_v33, %v219_v31  ;;  %v228_v37 = vld [vmem:[%s865_s2 + $0xc8] sm:$0xff]  ;;  %v230_v39 = vld [vmem:[%s865_s2 + $0xd8] sm:$0xff]  ;;  %v564_v40 = vpack.c.bf16 %v225_v35, %v221_v34  ;;  %v227_v43 = vld [vmem:[%s865_s2 + $0xc0] sm:$0xff]  ;;  %v269_v35 = vlaneseq }
  0x1e   : > { %529 = vmatpush1.bf16.msra.mxu0 %v528_v23  ;;  %v232_v38 = vld [vmem:[%s865_s2 + $0xe8] sm:$0xff]  ;;  %v234_v42 = vld [vmem:[%s865_s2 + $0xf8] sm:$0xff]  ;;  %v231_v44 = vld [vmem:[%s865_s2 + $0xe0] sm:$0xff] }
  0x1f   : > { %561 = vmatpush1.bf16.msra.mxu1 %v560_v27  ;;  %531 = vmatprep.subr.bf16.mxu0 %v530_v28  ;;  %v534_v41 = vpack.c.bf16 %v232_v38, %v228_v37  ;;  %v566_v45 = vpack.c.bf16 %v234_v42, %v230_v39  ;;  %v229_v46 = vld [vmem:[%s865_s2 + $0xd0] sm:$0xff]  ;;  %v236_v48 = vld [vmem:[%s865_s2 + $0x108] sm:$0xff]  ;;  %v238_v50 = vld [vmem:[%s865_s2 + $0x118] sm:$0xff]  ;;  %v536_v52 = vpack.c.bf16 %v231_v44, %v227_v43 }
  0x20   : > { %563 = vmatprep.subr.bf16.mxu1 %v562_v32  ;;  %v233_v47 = vld [vmem:[%s865_s2 + $0xf0] sm:$0xff]  ;;  %v240_v49 = vld [vmem:[%s865_s2 + $0x128] sm:$0xff]  ;;  %v242_v51 = vld [vmem:[%s865_s2 + $0x138] sm:$0xff] }
  0x21   : > { %v568_v53 = vpack.c.bf16 %v233_v47, %v229_v46  ;;  %v538_v54 = vpack.c.bf16 %v240_v49, %v236_v48  ;;  %v235_v55 = vld [vmem:[%s865_s2 + $0x100] sm:$0xff]  ;;  %v237_v57 = vld [vmem:[%s865_s2 + $0x110] sm:$0xff]  ;;  %v570_v58 = vpack.c.bf16 %v242_v51, %v238_v50  ;;  %v244_v60 = vld [vmem:[%s865_s2 + $0x148] sm:$0xff] }
  0x22   : > { %533 = vmatpush1.bf16.msra.mxu0 %v532_v36  ;;  %v239_v56 = vld [vmem:[%s865_s2 + $0x120] sm:$0xff]  ;;  %v241_v59 = vld [vmem:[%s865_s2 + $0x130] sm:$0xff]  ;;  %v248_v61 = vld [vmem:[%s865_s2 + $0x168] sm:$0xff]  ;;  %v270_v36 = vshrl.u32 %v269_v35, 7 }
  0x23   : > { %565 = vmatpush1.bf16.msra.mxu1 %v564_v40  ;;  %535 = vmatprep.subr.bf16.mxu0 %v534_v41  ;;  %v246_v62 = vld [vmem:[%s865_s2 + $0x158] sm:$0xff]  ;;  %v540_v0 = vpack.c.bf16 %v239_v56, %v235_v55  ;;  %v572_v1 = vpack.c.bf16 %v241_v59, %v237_v57  ;;  %v542_v2 = vpack.c.bf16 %v248_v61, %v244_v60  ;;  %v243_v3 = vld [vmem:[%s865_s2 + $0x140] sm:$0xff]  ;;  %v245_v5 = vld [vmem:[%s865_s2 + $0x150] sm:$0xff] }
  0x24   : > { %567 = vmatprep.subr.bf16.mxu1 %v566_v45  ;;  %v250_v63 = vld [vmem:[%s865_s2 + $0x178] sm:$0xff]  ;;  %v247_v4 = vld [vmem:[%s865_s2 + $0x160] sm:$0xff]  ;;  %v249_v7 = vld [vmem:[%s865_s2 + $0x170] sm:$0xff]  ;;  %v279_v37 = vsub.s32 2, %v270_v36  ;;  %v275_v38 = vsub.s32 1, %v270_v36  ;;  %v283_v59 = vsub.s32 3, %v270_v36 }
  0x25   : > { %v574_v6 = vpack.c.bf16 %v250_v63, %v246_v62  ;;  %v252_v8 = vld [vmem:[%s865_s2 + $0x188] sm:$0xff]  ;;  %v254_v10 = vld [vmem:[%s865_s2 + $0x198] sm:$0xff]  ;;  %v544_v12 = vpack.c.bf16 %v247_v4, %v243_v3  ;;  %v576_v13 = vpack.c.bf16 %v249_v7, %v245_v5  ;;  %v251_v15 = vld [vmem:[%s865_s2 + $0x180] sm:$0xff] }
  0x26   : > { %537 = vmatpush1.bf16.msra.mxu0 %v536_v52  ;;  %v256_v9 = vld [vmem:[%s865_s2 + $0x1a8] sm:$0xff]  ;;  %v258_v11 = vld [vmem:[%s865_s2 + $0x1b8] sm:$0xff]  ;;  %v255_v16 = vld [vmem:[%s865_s2 + $0x1a0] sm:$0xff] }
  0x27   : > { %569 = vmatpush1.bf16.msra.mxu1 %v568_v53  ;;  %539 = vmatprep.subr.bf16.mxu0 %v538_v54  ;;  %v546_v14 = vpack.c.bf16 %v256_v9, %v252_v8  ;;  %v253_v17 = vld [vmem:[%s865_s2 + $0x190] sm:$0xff]  ;;  %v578_v18 = vpack.c.bf16 %v258_v11, %v254_v10  ;;  %v260_v20 = vld [vmem:[%s865_s2 + $0x1c8] sm:$0xff]  ;;  %v262_v22 = vld [vmem:[%s865_s2 + $0x1d8] sm:$0xff]  ;;  %v548_v24 = vpack.c.bf16 %v255_v16, %v251_v15 }
  0x28   : > { %571 = vmatprep.subr.bf16.mxu1 %v570_v58  ;;  %v257_v19 = vld [vmem:[%s865_s2 + $0x1b0] sm:$0xff]  ;;  %v264_v21 = vld [vmem:[%s865_s2 + $0x1e8] sm:$0xff]  ;;  %v266_v23 = vld [vmem:[%s865_s2 + $0x1f8] sm:$0xff]  ;;  %v271_v58 = vsub.s32 0, %v270_v36 }
  0x29   : > { %v580_v25 = vpack.c.bf16 %v257_v19, %v253_v17  ;;  %v550_v26 = vpack.c.bf16 %v264_v21, %v260_v20  ;;  %v259_v27 = vld [vmem:[%s865_s2 + $0x1c0] sm:$0xff]  ;;  %v582_v29 = vpack.c.bf16 %v266_v23, %v262_v22  ;;  %v261_v30 = vld [vmem:[%s865_s2 + $0x1d0] sm:$0xff]  ;;  %v432_v44 = vld [vmem:[%s656_s25 + $0x8] sm:$0xff] }
  0x2a   : > { %541 = vmatpush1.bf16.msra.mxu0 %v540_v0  ;;  %v263_v28 = vld [vmem:[%s865_s2 + $0x1e0] sm:$0xff]  ;;  %v265_v31 = vld [vmem:[%s865_s2 + $0x1f0] sm:$0xff] }
  0x2b   : > { %573 = vmatpush1.bf16.msra.mxu1 %v572_v1  ;;  %543 = vmatprep.subr.bf16.mxu0 %v542_v2  ;;  %v552_v32 = vpack.c.bf16 %v263_v28, %v259_v27  ;;  %v584_v33 = vpack.c.bf16 %v265_v31, %v261_v30  ;;  %v202_v34 = vld [vmem:[#allocation2] sm:$0xff]  ;;  %v433_v3 = vld [vmem:[%s656_s25 + $0x10] sm:$0xff] }
  0x2c   : > { %575 = vmatprep.subr.bf16.mxu1 %v574_v6  ;;  %v267_v39 = vld [vmem:[%s866_s3] sm:$0xf] }
  0x2d   : > { %v280_v40 = vrot.slane %v267_v39, %v279_v37  ;;  %v276_v41 = vrot.slane %v267_v39, %v275_v38  ;;  %v431_v46 = vld [vmem:[%s656_s25] sm:$0xff]  ;;  %v272_v60 = vrot.slane %v267_v39, %v271_v58  ;;  %v284_v61 = vrot.slane %v267_v39, %v283_v59 }
  0x2e   : > { %545 = vmatpush1.bf16.msra.mxu0 %v544_v12 }
  0x2f   : > { %577 = vmatpush1.bf16.msra.mxu1 %v576_v13  ;;  %547 = vmatprep.subr.bf16.mxu0 %v546_v14 }
  0x30   : > { %579 = vmatprep.subr.bf16.mxu1 %v578_v18 }
  0x32   : > { %549 = vmatpush1.bf16.msra.mxu0 %v548_v24 }
  0x33   : > { %581 = vmatpush1.bf16.msra.mxu1 %v580_v25  ;;  %551 = vmatprep.subr.bf16.mxu0 %v550_v26 }
  0x34   : > { %583 = vmatprep.subr.bf16.mxu1 %v582_v29 }
  0x36   : > { %553 = vmatpush1.bf16.msra.mxu0 %v552_v32 }
  0x37   : > { %585 = vmatpush1.bf16.msra.mxu1 %v584_v33 }
  0x39   : > { %354 = vmatmul.mubr.f32.vlgmr.msra.gmra.mrb[0].mxu0 %v202_v34 }
  0x3a   : > { %425 = vmatmul.mubr.f32.vlgmr.msra.gmra.mrb[0].mxu1 %v202_v34 }
 0x10c   : > { %v355_v42 = vpop.f32.mrb[0].mxu0 }
 0x10d   : > { %v426_v43 = vpop.f32.mrb[0].mxu1  ;;  %v357_v45 = vpop.f32.mrb[1].mxu0  ;;  %v356_v62 = vadd.f32 %v355_v42, %v272_v60 }
 0x10e   : > { %v427_v47 = vadd.f32 %v426_v43, %v280_v40  ;;  %v358_v48 = vadd.f32 %v357_v45, %v276_v41  ;;  %v428_v49 = vpop.f32.mrb[1].mxu1 }
 0x10f   : > { %v429_v0 = vadd.f32 %v428_v49, %v284_v61 }
 0x110   : > { %v441_v50 = vadd.f32 %v432_v44, %v427_v47  ;;  %v434_v51 = vadd.f32 %v431_v46, %v358_v48 }
 0x112   : > { %v519_v52 = vmul.f32 -1.442695, %v441_v50  ;;  %v518_v53 = vmul.f32 -1.442695, %v434_v51 }
 0x114   : > { %596 = vpow2.f32 %v519_v52 }
 0x115   : > { %598 = vpow2.f32 %v518_v53 }
 0x11e   : > { %v597_v54 = vpop.eup %596 }
 0x11f   : > { %v599_v55 = vpop.eup %598  ;;  %v445_v56 = vadd.f32 1.0, %v597_v54 }
 0x120   : > { %v438_v57 = vadd.f32 1.0, %v599_v55 }
 0x121   : > { %600 = vrcp.f32 %v445_v56 }
 0x122   : > { %602 = vrcp.f32 %v438_v57 }
 0x12b   : > { %v601_v63 = vpop.eup %600 }
 0x12c   : > { %v603_v1 = vpop.eup %602  ;;  %v453_v2 = vmul.f32 %v601_v63, %v356_v62  ;;  %v451_v6 = vsub.f32 1.0, %v601_v63 }
 0x12d   : > { %v448_v4 = vmul.f32 %v603_v1, %v429_v0 }
 0x12f   : > { %v449_v5 = vadd.f32 %v448_v4, %v433_v3 }
 0x131   : > { %604 = vtanh.f32 %v449_v5 }
 0x13b   : > { %v605_v7 = vpop.eup %604 }
 0x13c   : > { %v452_v8 = vmul.f32 %v605_v7, %v451_v6 }
 0x13e   : > { %v454_v9 = vadd.f32 %v453_v2, %v452_v8 }
 0x140   : > { %455 = vst [vmem:[#allocation2] sm:$0xff] %v454_v9  ;;  %456 = vst [vmem:[%s651_s22] sm:$0xff] %v454_v9 }
 0x141 PF: > { %s14_s15 = sadd.s32 1, %s612_s15  }
 0x142   : > { %p11_p5 = scmp.ge.s32.totalorder %s14_s15, 7  }
 0x144   :  { %13 = sbr.rel (!%p11_p5) target bundleno = 1 (0x1), region = 70 }

</bundles_post_ra>
